<compile_context>
chip_gen: v7x
topology: tpu7x:2x2x1
jax: 0.10.0
libtpu: 0.0.40
codegen_flags: <defaults>
</compile_context>

<pallas_src>
import jax
import jax.numpy as jnp
from jax.experimental import pallas as pl
from jax.experimental.pallas import tpu as pltpu


# Logical layer sizes (PyTorch MLP) and lane-dense padded output sizes.
IN_DIM = 28 * 28                    # 784 (not padded: equals full array dim)
HIDDEN = [140, 130, 120, 110]
OUT_DIM = 10

HIDDEN_PAD = [256, 256, 128, 128]   # 140,130,120,110 -> 256,256,128,128
OUT_PAD = 128                       # 10 -> 128 (lane-dense unmasked stores)


def _round_up(x, m):
    return (x + m - 1) // m * m


def mlp_kernel(x_ref,
               w1_ref, b1_ref,
               w2_ref, b2_ref,
               w3_ref, b3_ref,
               w4_ref, b4_ref,
               w5_ref, b5_ref,
               o_ref):
    # x tile and weights are bf16 (native MXU inputs); accumulate in f32 and
    # add the f32 bias; intermediates are kept bf16 between layers (relu in
    # bf16 == bf16(relu in f32), so this is exact relative to the reference).
    h = x_ref[...]                                             # (tile_b, 784) bf16

    a = jnp.dot(h, w1_ref[...], preferred_element_type=jnp.float32) + b1_ref[...]
    h = jnp.maximum(a.astype(jnp.bfloat16), 0.0)

    a = jnp.dot(h, w2_ref[...], preferred_element_type=jnp.float32) + b2_ref[...]
    h = jnp.maximum(a.astype(jnp.bfloat16), 0.0)

    a = jnp.dot(h, w3_ref[...], preferred_element_type=jnp.float32) + b3_ref[...]
    h = jnp.maximum(a.astype(jnp.bfloat16), 0.0)

    a = jnp.dot(h, w4_ref[...], preferred_element_type=jnp.float32) + b4_ref[...]
    h = jnp.maximum(a.astype(jnp.bfloat16), 0.0)

    a = jnp.dot(h, w5_ref[...], preferred_element_type=jnp.float32) + b5_ref[...]
    o_ref[...] = a.astype(o_ref.dtype)                         # bf16 out, lane-dense


def prepare_params(params):
    """Pad weights/biases once to lane-dense output widths; cast weights to bf16.

    params: list of (W_t, b) with W_t of shape (in, out) in f32.
    Returns flat list [W1,b1, ..., W5,b5].  W1 keeps its 784 input rows (no
    feature-dim padding of x); hidden/out dims are padded to multiples of 128.
    """
    in_pads = [IN_DIM] + HIDDEN_PAD
    out_pads = HIDDEN_PAD + [OUT_PAD]
    flat = []
    for (w, b), ip, op in zip(params, in_pads, out_pads):
        fi, fo = w.shape
        w_p = jnp.zeros((ip, op), jnp.float32).at[:fi, :fo].set(w).astype(jnp.bfloat16)
        b_p = jnp.zeros((1, op), jnp.float32).at[0, :fo].set(b)
        flat += [w_p, b_p]
    return flat


def _choose_tile_b(B, max_tile_b=2048):
    """Batch tile: multiple of 16 (bf16 sublane packing).

    Small batches get a single tile/grid step.  Large batches are split into
    >=4 grid steps (so the "parallel" axis can shard across v7x's two
    TensorCores) while keeping tiles >=512 rows to amortize the ~0.35us
    per-step overhead and <=max_tile_b for VMEM headroom.
    """
    b16 = _round_up(max(B, 1), 16)
    if b16 <= 1024:
        return b16
    tile = _round_up(pl.cdiv(B, 4), 16)
    return max(512, min(tile, max_tile_b))


def mlp_forward(x_nchw, flat_params):
    """x_nchw: (B, 1, 28, 28) f32.  flat_params: output of prepare_params."""
    B = x_nchw.shape[0]
    x_flat = x_nchw.reshape(B, -1)

    tile_b = _choose_tile_b(B)
    b_pad = _round_up(B, tile_b)

    # Single fused reshape+cast (+ batch pad only if needed): no f32 padded
    # copy, no feature-dim pad round-trip through HBM.
    if b_pad == B:
        x_p = x_flat.astype(jnp.bfloat16)
    else:
        x_p = jnp.zeros((b_pad, IN_DIM), jnp.bfloat16).at[:B].set(
            x_flat.astype(jnp.bfloat16))

    grid = (b_pad // tile_b,)

    x_spec = pl.BlockSpec((tile_b, IN_DIM), lambda i: (i, 0))
    out_spec = pl.BlockSpec((tile_b, OUT_PAD), lambda i: (i, 0))
    # Weights/biases: full-array blocks, constant index_map -> stay resident
    # in VMEM across grid steps (~1.4 MB bf16 total).
    param_specs = [pl.BlockSpec(p.shape, lambda i: (0, 0)) for p in flat_params]

    dims = [IN_DIM] + HIDDEN_PAD + [OUT_PAD]
    flops = 2 * b_pad * sum(a * b for a, b in zip(dims[:-1], dims[1:]))
    bytes_accessed = (b_pad * IN_DIM * 2                 # bf16 x
                      + b_pad * OUT_PAD * 2              # bf16 out
                      + sum(int(p.size) * p.dtype.itemsize for p in flat_params))

    out = pl.pallas_call(
        mlp_kernel,
        out_shape=jax.ShapeDtypeStruct((b_pad, OUT_PAD), jnp.bfloat16),
        grid=grid,
        in_specs=[x_spec] + param_specs,
        out_specs=out_spec,
        compiler_params=pltpu.CompilerParams(
            dimension_semantics=("parallel",),
            # 2 bufs x 2048 x 784 x 2B (~6.4 MB) for x, ~1 MB out, ~2.8 MB
            # weights: fits comfortably; explicit limit covers v5e's 16 MiB
            # scoped default and stays within v7x's 32 MiB scoped VMEM.
            vmem_limit_bytes=32 * 1024 * 1024),
        cost_estimate=pl.CostEstimate(flops=flops, transcendentals=0,
                                      bytes_accessed=bytes_accessed),
    )(x_p, *flat_params)

    return out[:B, :OUT_DIM].astype(jnp.float32)


def init_params(key):
    """Deterministic init matching the PyTorch layer shapes (weights stored (in, out))."""
    dims = [(IN_DIM, 140), (140, 130), (130, 120), (120, 110), (110, OUT_DIM)]
    params = []
    for (fan_in, fan_out) in dims:
        key, kw, kb = jax.random.split(key, 3)
        bound = 1.0 / jnp.sqrt(fan_in)
        w_t = jax.random.uniform(kw, (fan_in, fan_out), jnp.float32, -bound, bound)
        b = jax.random.uniform(kb, (fan_out,), jnp.float32, -bound, bound)
        params.append((w_t, b))
    return params


def reference_forward(x_nchw, params):
    """Pure-JAX reference mirroring the kernel's bf16 matmul inputs with f32
    accumulation (intermediates are re-quantized to bf16 before each matmul,
    matching the kernel's bf16 inter-layer activations)."""
    h = x_nchw.reshape(x_nchw.shape[0], -1).astype(jnp.float32)
    for i, (w, b) in enumerate(params):
        w_q = w.astype(jnp.bfloat16).astype(jnp.float32)
        h_q = h.astype(jnp.bfloat16).astype(jnp.float32)
        h = h_q @ w_q + b
        if i < len(params) - 1:
            h = jnp.maximum(h, 0.0)
    return h


if __name__ == "__main__":
    key = jax.random.PRNGKey(0)
    key, kx = jax.random.split(key)

    # Small batch, MNIST-like input as implied by fc1 = Linear(28*28, 140).
    x = jax.random.normal(kx, (2, 1, 28, 28), jnp.float32)
    params = init_params(key)
    flat_params = prepare_params(params)

    out = mlp_forward(x, flat_params)
    out = jax.block_until_ready(out)

    ref = reference_forward(x, params)
    assert out.shape == (2, 10)
    # Kernel output passes through one extra bf16 rounding vs. the f32 ref.
    assert jnp.allclose(out, ref, atol=1e-2, rtol=1e-2), (
        float(jnp.max(jnp.abs(out - ref))))

    print("KERNEL_OK")
</pallas_src>

<mosaic_0001>
module attributes {stable_mosaic.version = 11 : i64} {
  func.func @mlp_kernel(%arg0: i32, %arg1: memref<16x784xbf16, #tpu.memory_space<vmem>>, %arg2: memref<784x256xbf16, #tpu.memory_space<vmem>>, %arg3: memref<1x256xf32, #tpu.memory_space<vmem>>, %arg4: memref<256x256xbf16, #tpu.memory_space<vmem>>, %arg5: memref<1x256xf32, #tpu.memory_space<vmem>>, %arg6: memref<256x128xbf16, #tpu.memory_space<vmem>>, %arg7: memref<1x128xf32, #tpu.memory_space<vmem>>, %arg8: memref<128x128xbf16, #tpu.memory_space<vmem>>, %arg9: memref<1x128xf32, #tpu.memory_space<vmem>>, %arg10: memref<128x128xbf16, #tpu.memory_space<vmem>>, %arg11: memref<1x128xf32, #tpu.memory_space<vmem>>, %arg12: memref<16x128xbf16, #tpu.memory_space<vmem>>) attributes {dimension_semantics = [#tpu.dimension_semantics<parallel>], iteration_bounds = array<i64: 1>, scalar_prefetch = 0 : i64, scratch_operands = 0 : i64, tpu.core_type = #tpu.core_type<tc>, window_params = [{transform_indices = @transform_0, window_bounds = array<i64: 16, 784>}, {pipeline_mode = #tpu.pipeline_mode<synchronous>, transform_indices = @transform_1, window_bounds = array<i64: 784, 256>}, {pipeline_mode = #tpu.pipeline_mode<synchronous>, transform_indices = @transform_2, window_bounds = array<i64: 1, 256>}, {pipeline_mode = #tpu.pipeline_mode<synchronous>, transform_indices = @transform_3, window_bounds = array<i64: 256, 256>}, {pipeline_mode = #tpu.pipeline_mode<synchronous>, transform_indices = @transform_4, window_bounds = array<i64: 1, 256>}, {pipeline_mode = #tpu.pipeline_mode<synchronous>, transform_indices = @transform_5, window_bounds = array<i64: 256, 128>}, {pipeline_mode = #tpu.pipeline_mode<synchronous>, transform_indices = @transform_6, window_bounds = array<i64: 1, 128>}, {pipeline_mode = #tpu.pipeline_mode<synchronous>, transform_indices = @transform_7, window_bounds = array<i64: 128, 128>}, {pipeline_mode = #tpu.pipeline_mode<synchronous>, transform_indices = @transform_8, window_bounds = array<i64: 1, 128>}, {pipeline_mode = #tpu.pipeline_mode<synchronous>, transform_indices = @transform_9, window_bounds = array<i64: 128, 128>}, {pipeline_mode = #tpu.pipeline_mode<synchronous>, transform_indices = @transform_10, window_bounds = array<i64: 1, 128>}, {transform_indices = @transform_11, window_bounds = array<i64: 16, 128>}]} {
    %c0 = arith.constant 0 : index
    %c0_0 = arith.constant 0 : index
    %0 = vector.load %arg1[%c0, %c0_0] : memref<16x784xbf16, #tpu.memory_space<vmem>>, vector<16x784xbf16>
    %c0_1 = arith.constant 0 : index
    %c0_2 = arith.constant 0 : index
    %1 = vector.load %arg2[%c0_1, %c0_2] : memref<784x256xbf16, #tpu.memory_space<vmem>>, vector<784x256xbf16>
    %cst = arith.constant dense<0.000000e+00> : vector<16x256xf32>
    %2 = tpu.matmul %0, %1, %cst {dimension_numbers = #tpu.dot_dimension_numbers<[1], [0], [0], [1], [0, 0, 1, 1], [], []>} : vector<16x784xbf16>, vector<784x256xbf16>, vector<16x256xf32> -> vector<16x256xf32>
    %c0_3 = arith.constant 0 : index
    %c0_4 = arith.constant 0 : index
    %3 = vector.load %arg3[%c0_3, %c0_4] : memref<1x256xf32, #tpu.memory_space<vmem>>, vector<1x256xf32>
    %4 = vector.broadcast %3 : vector<1x256xf32> to vector<16x256xf32>
    %5 = arith.addf %2, %4 : vector<16x256xf32>
    %6 = arith.truncf %5 : vector<16x256xf32> to vector<16x256xbf16>
    %cst_5 = arith.constant 0.000000e+00 : bf16
    %7 = vector.broadcast %cst_5 : bf16 to vector<16x256xbf16>
    %8 = arith.maximumf %6, %7 : vector<16x256xbf16>
    %c0_6 = arith.constant 0 : index
    %c0_7 = arith.constant 0 : index
    %9 = vector.load %arg4[%c0_6, %c0_7] : memref<256x256xbf16, #tpu.memory_space<vmem>>, vector<256x256xbf16>
    %cst_8 = arith.constant dense<0.000000e+00> : vector<16x256xf32>
    %10 = tpu.matmul %8, %9, %cst_8 {dimension_numbers = #tpu.dot_dimension_numbers<[1], [0], [0], [1], [0, 0, 1, 1], [], []>} : vector<16x256xbf16>, vector<256x256xbf16>, vector<16x256xf32> -> vector<16x256xf32>
    %c0_9 = arith.constant 0 : index
    %c0_10 = arith.constant 0 : index
    %11 = vector.load %arg5[%c0_9, %c0_10] : memref<1x256xf32, #tpu.memory_space<vmem>>, vector<1x256xf32>
    %12 = vector.broadcast %11 : vector<1x256xf32> to vector<16x256xf32>
    %13 = arith.addf %10, %12 : vector<16x256xf32>
    %14 = arith.truncf %13 : vector<16x256xf32> to vector<16x256xbf16>
    %cst_11 = arith.constant 0.000000e+00 : bf16
    %15 = vector.broadcast %cst_11 : bf16 to vector<16x256xbf16>
    %16 = arith.maximumf %14, %15 : vector<16x256xbf16>
    %c0_12 = arith.constant 0 : index
    %c0_13 = arith.constant 0 : index
    %17 = vector.load %arg6[%c0_12, %c0_13] : memref<256x128xbf16, #tpu.memory_space<vmem>>, vector<256x128xbf16>
    %cst_14 = arith.constant dense<0.000000e+00> : vector<16x128xf32>
    %18 = tpu.matmul %16, %17, %cst_14 {dimension_numbers = #tpu.dot_dimension_numbers<[1], [0], [0], [1], [0, 0, 1, 1], [], []>} : vector<16x256xbf16>, vector<256x128xbf16>, vector<16x128xf32> -> vector<16x128xf32>
    %c0_15 = arith.constant 0 : index
    %c0_16 = arith.constant 0 : index
    %19 = vector.load %arg7[%c0_15, %c0_16] : memref<1x128xf32, #tpu.memory_space<vmem>>, vector<1x128xf32>
    %20 = vector.broadcast %19 : vector<1x128xf32> to vector<16x128xf32>
    %21 = arith.addf %18, %20 : vector<16x128xf32>
    %22 = arith.truncf %21 : vector<16x128xf32> to vector<16x128xbf16>
    %cst_17 = arith.constant 0.000000e+00 : bf16
    %23 = vector.broadcast %cst_17 : bf16 to vector<16x128xbf16>
    %24 = arith.maximumf %22, %23 : vector<16x128xbf16>
    %c0_18 = arith.constant 0 : index
    %c0_19 = arith.constant 0 : index
    %25 = vector.load %arg8[%c0_18, %c0_19] : memref<128x128xbf16, #tpu.memory_space<vmem>>, vector<128x128xbf16>
    %cst_20 = arith.constant dense<0.000000e+00> : vector<16x128xf32>
    %26 = tpu.matmul %24, %25, %cst_20 {dimension_numbers = #tpu.dot_dimension_numbers<[1], [0], [0], [1], [0, 0, 1, 1], [], []>} : vector<16x128xbf16>, vector<128x128xbf16>, vector<16x128xf32> -> vector<16x128xf32>
    %c0_21 = arith.constant 0 : index
    %c0_22 = arith.constant 0 : index
    %27 = vector.load %arg9[%c0_21, %c0_22] : memref<1x128xf32, #tpu.memory_space<vmem>>, vector<1x128xf32>
    %28 = vector.broadcast %27 : vector<1x128xf32> to vector<16x128xf32>
    %29 = arith.addf %26, %28 : vector<16x128xf32>
    %30 = arith.truncf %29 : vector<16x128xf32> to vector<16x128xbf16>
    %cst_23 = arith.constant 0.000000e+00 : bf16
    %31 = vector.broadcast %cst_23 : bf16 to vector<16x128xbf16>
    %32 = arith.maximumf %30, %31 : vector<16x128xbf16>
    %c0_24 = arith.constant 0 : index
    %c0_25 = arith.constant 0 : index
    %33 = vector.load %arg10[%c0_24, %c0_25] : memref<128x128xbf16, #tpu.memory_space<vmem>>, vector<128x128xbf16>
    %cst_26 = arith.constant dense<0.000000e+00> : vector<16x128xf32>
    %34 = tpu.matmul %32, %33, %cst_26 {dimension_numbers = #tpu.dot_dimension_numbers<[1], [0], [0], [1], [0, 0, 1, 1], [], []>} : vector<16x128xbf16>, vector<128x128xbf16>, vector<16x128xf32> -> vector<16x128xf32>
    %c0_27 = arith.constant 0 : index
    %c0_28 = arith.constant 0 : index
    %35 = vector.load %arg11[%c0_27, %c0_28] : memref<1x128xf32, #tpu.memory_space<vmem>>, vector<1x128xf32>
    %36 = vector.broadcast %35 : vector<1x128xf32> to vector<16x128xf32>
    %37 = arith.addf %34, %36 : vector<16x128xf32>
    %38 = arith.truncf %37 : vector<16x128xf32> to vector<16x128xbf16>
    %c0_29 = arith.constant 0 : index
    %c0_30 = arith.constant 0 : index
    %39 = vector.load %arg12[%c0_29, %c0_30] : memref<16x128xbf16, #tpu.memory_space<vmem>>, vector<16x128xbf16>
    tpu.vector_store %arg12[%c0_29, %c0_30], %38 {strides = array<i32>} : memref<16x128xbf16, #tpu.memory_space<vmem>>, vector<16x128xbf16>,
    return
  }
  func.func @transform_0(%arg0: i32) -> (i32, i32) {
    %c0_i32 = arith.constant 0 : i32
    %c0_i32_0 = arith.constant 0 : i32
    return %arg0, %c0_i32 : i32, i32
  }
  func.func @transform_1(%arg0: i32) -> (i32, i32) {
    %c0_i32 = arith.constant 0 : i32
    %c0_i32_0 = arith.constant 0 : i32
    %c0_i32_1 = arith.constant 0 : i32
    return %c0_i32, %c0_i32_0 : i32, i32
  }
  func.func @transform_2(%arg0: i32) -> (i32, i32) {
    %c0_i32 = arith.constant 0 : i32
    %c0_i32_0 = arith.constant 0 : i32
    %c0_i32_1 = arith.constant 0 : i32
    return %c0_i32, %c0_i32_0 : i32, i32
  }
  func.func @transform_3(%arg0: i32) -> (i32, i32) {
    %c0_i32 = arith.constant 0 : i32
    %c0_i32_0 = arith.constant 0 : i32
    %c0_i32_1 = arith.constant 0 : i32
    return %c0_i32, %c0_i32_0 : i32, i32
  }
  func.func @transform_4(%arg0: i32) -> (i32, i32) {
    %c0_i32 = arith.constant 0 : i32
    %c0_i32_0 = arith.constant 0 : i32
    %c0_i32_1 = arith.constant 0 : i32
    return %c0_i32, %c0_i32_0 : i32, i32
  }
  func.func @transform_5(%arg0: i32) -> (i32, i32) {
    %c0_i32 = arith.constant 0 : i32
    %c0_i32_0 = arith.constant 0 : i32
    %c0_i32_1 = arith.constant 0 : i32
    return %c0_i32, %c0_i32_0 : i32, i32
  }
  func.func @transform_6(%arg0: i32) -> (i32, i32) {
    %c0_i32 = arith.constant 0 : i32
    %c0_i32_0 = arith.constant 0 : i32
    %c0_i32_1 = arith.constant 0 : i32
    return %c0_i32, %c0_i32_0 : i32, i32
  }
  func.func @transform_7(%arg0: i32) -> (i32, i32) {
    %c0_i32 = arith.constant 0 : i32
    %c0_i32_0 = arith.constant 0 : i32
    %c0_i32_1 = arith.constant 0 : i32
    return %c0_i32, %c0_i32_0 : i32, i32
  }
  func.func @transform_8(%arg0: i32) -> (i32, i32) {
    %c0_i32 = arith.constant 0 : i32
    %c0_i32_0 = arith.constant 0 : i32
    %c0_i32_1 = arith.constant 0 : i32
    return %c0_i32, %c0_i32_0 : i32, i32
  }
  func.func @transform_9(%arg0: i32) -> (i32, i32) {
    %c0_i32 = arith.constant 0 : i32
    %c0_i32_0 = arith.constant 0 : i32
    %c0_i32_1 = arith.constant 0 : i32
    return %c0_i32, %c0_i32_0 : i32, i32
  }
  func.func @transform_10(%arg0: i32) -> (i32, i32) {
    %c0_i32 = arith.constant 0 : i32
    %c0_i32_0 = arith.constant 0 : i32
    %c0_i32_1 = arith.constant 0 : i32
    return %c0_i32, %c0_i32_0 : i32, i32
  }
  func.func @transform_11(%arg0: i32) -> (i32, i32) {
    %c0_i32 = arith.constant 0 : i32
    %c0_i32_0 = arith.constant 0 : i32
    return %arg0, %c0_i32 : i32, i32
  }
}

</mosaic_0001>

<bundles_post_ra>
// kernel: tpu_custom_call.1
= control target key start
LH: loop header
LB: loop body
LE: loop exit
PB: predicated region body
PF: predicated region fallthrough
CT: control target
= control target key end

     0   :  { %16 = vsyncpa [#allocation3], 0  ;;  %s2545_s0 = inlined_call_operand.hbm [shape: bf16[16,784], index: 0, kind: input, shape index: {}]   ;;  %s2546_s1 = inlined_call_operand.hbm [shape: bf16[784,256], index: 1, kind: input, shape index: {}]   ;;  %s2547_s2 = inlined_call_operand.vmem [shape: f32[1,256], index: 2, kind: input, shape index: {}]   ;;  %s2548_s3 = inlined_call_operand.hbm [shape: bf16[256,256], index: 3, kind: input, shape index: {}]   ;;  %s2549_s4 = inlined_call_operand.vmem [shape: f32[1,256], index: 4, kind: input, shape index: {}]   ;;  %s2550_s5 = inlined_call_operand.hbm [shape: bf16[256,128], index: 5, kind: input, shape index: {}]   ;;  %s2551_s6 = inlined_call_operand.vmem [shape: f32[1,128], index: 6, kind: input, shape index: {}]   ;;  %s2552_s7 = inlined_call_operand.hbm [shape: bf16[128,128], index: 7, kind: input, shape index: {}]   ;;  %s2553_s8 = inlined_call_operand.vmem [shape: f32[1,128], index: 8, kind: input, shape index: {}]   ;;  %s2554_s9 = inlined_call_operand.hbm [shape: bf16[128,128], index: 9, kind: input, shape index: {}]   ;;  %s2555_s10 = inlined_call_operand.vmem [shape: f32[1,128], index: 10, kind: input, shape index: {}]   ;;  %s2556_s11 = inlined_call_operand.hbm [shape: bf16[16,128], index: 11, kind: output, shape index: {}]  }
   0x1   :  { %17 = vsyncpa [#allocation6], 0 }
   0x2   :  { %18 = vsyncpa [#allocation9], 0 }
   0x3   :  { %19 = vsyncpa [#allocation12], 0 }
   0x4   :  { %20 = vsyncpa [#allocation4], 0  ;;  %s2325_s17 = smov [#allocation5]   ;;  %s2161_s21 = scalar_lea.hbm %s2546_s1, 12544 }
   0x5   :  { %s38_s18 = sshll.u32 %s2325_s17, 4  ;;  %p2162_p0 = scmp.ne.s32.totalorder %s2546_s1, %s2161_s21  ;;  %s39_s18 = int_to_ptr.vmem [resolvable:$true] %s38_s18 }
   0x6   :  { %p2165_p1 = scmp.lt.u32.totalorder %s2161_s21, %s2546_s1 }
   0x8   :  { %p2167_p2 = pnand %p2165_p1, %p2162_p0 }
   0xa   :  { %2170 = shalt.err (!%p2167_p2)
}
   0xb   :  { %s2171_s26 = scalar_lea.vmem %s39_s18, 12544  ;;  %p2176_p4 = scmp.lt.s32.totalorder %s39_s18, %s39_s18 }
   0xc   :  { %p2172_p3 = scmp.ne.s32.totalorder %s39_s18, %s2171_s26  ;;  %p2177_p5 = scmp.lt.s32.totalorder %s2171_s26, %s2171_s26 }
   0xe   :  { %p2178_p6 = por %p2177_p5, %p2176_p4 }
  0x10   :  { %p2179_p7 = pnand %p2178_p6, %p2172_p3 }
  0x12   :  { %2182 = shalt.err (!%p2179_p7)
}
  0x13   :  { %s2326_s27 = smov 128   ;;  %s2327_s28 = smov 8  }
  0x14   :  { %44 = dma.hbm_to_vmem [thread:$0]  %s2546_s1, 12544, %s39_s18, [#allocation6], %s2326_s27, %s2326_s27, %s2327_s28  }
  0x15   :  { %s2328_s12 = smov [#allocation8]   ;;  %s2183_s16 = scalar_lea.hbm %s2550_s5, 2048 }
  0x16   :  { %s66_s13 = sshll.u32 %s2328_s12, 4  ;;  %p2184_p8 = scmp.ne.s32.totalorder %s2550_s5, %s2183_s16  ;;  %s67_s13 = int_to_ptr.vmem [resolvable:$true] %s66_s13 }
  0x17   :  { %p2187_p9 = scmp.lt.u32.totalorder %s2183_s16, %s2550_s5 }
  0x19   :  { %p2189_p10 = pnand %p2187_p9, %p2184_p8 }
  0x1b   :  { %2192 = shalt.err (!%p2189_p10)
}
  0x1c   :  { %s2193_s22 = scalar_lea.vmem %s67_s13, 2048  ;;  %p2198_p12 = scmp.lt.s32.totalorder %s67_s13, %s67_s13 }
  0x1d   :  { %p2194_p11 = scmp.ne.s32.totalorder %s67_s13, %s2193_s22  ;;  %p2199_p13 = scmp.lt.s32.totalorder %s2193_s22, %s2193_s22 }
  0x1f   :  { %p2200_p0 = por %p2199_p13, %p2198_p12 }
  0x21   :  { %p2201_p1 = pnand %p2200_p0, %p2194_p11 }
  0x23   :  { %2204 = shalt.err (!%p2201_p1)
}
  0x24   :  { %s2329_s1 = smov 64   ;;  %s2330_s18 = smov 4  }
  0x25   :  { %72 = dma.hbm_to_vmem [thread:$0]  %s2550_s5, 2048, %s67_s13, [#allocation9], %s2329_s1, %s2329_s1, %s2330_s18  }
  0x26   :  { %s2331_s25 = smov [#allocation2]   ;;  %s2205_s12 = scalar_lea.hbm %s2545_s0, 896 }
  0x27   :  { %s26_s26 = sshll.u32 %s2331_s25, 4  ;;  %p2206_p2 = scmp.ne.s32.totalorder %s2545_s0, %s2205_s12  ;;  %s27_s26 = int_to_ptr.vmem [resolvable:$true] %s26_s26 }
  0x28   :  { %p2209_p3 = scmp.lt.u32.totalorder %s2205_s12, %s2545_s0 }
  0x2a   :  { %p2211_p4 = pnand %p2209_p3, %p2206_p2 }
  0x2c   :  { %2214 = shalt.err (!%p2211_p4)
}
  0x2d   :  { %s2215_s19 = scalar_lea.vmem %s27_s26, 896  ;;  %p2220_p6 = scmp.lt.s32.totalorder %s27_s26, %s27_s26 }
  0x2e   :  { %p2216_p5 = scmp.ne.s32.totalorder %s27_s26, %s2215_s19  ;;  %p2221_p7 = scmp.lt.s32.totalorder %s2215_s19, %s2215_s19 }
  0x30   :  { %p2222_p8 = por %p2221_p7, %p2220_p6 }
  0x32   :  { %p2223_p9 = pnand %p2222_p8, %p2216_p5 }
  0x34   :  { %2226 = shalt.err (!%p2223_p9)
}
  0x35   :  { %s2332_s5 = smov 448   ;;  %s2333_s13 = smov 28  }
  0x36   :  { %32 = dma.hbm_to_vmem [thread:$0]  %s2545_s0, 896, %s27_s26, [#allocation3], %s2332_s5, %s2332_s5, %s2333_s13  }
  0x37   :  { %s2334_s22 = smov [#allocation7]   ;;  %s2335_s24 = smov [#allocation10]  }
  0x38   :  { %s52_s23 = sshll.u32 %s2334_s22, 4  ;;  %s80_s25 = sshll.u32 %s2335_s24, 4  ;;  %s53_s23 = int_to_ptr.vmem [resolvable:$true] %s52_s23  ;;  %s81_s25 = int_to_ptr.vmem [resolvable:$true] %s80_s25 }
  0x39   :  { %s2227_s12 = scalar_lea.hbm %s2548_s3, 4096 }
  0x3a   :  { %p2228_p10 = scmp.ne.s32.totalorder %s2548_s3, %s2227_s12  ;;  %p2231_p11 = scmp.lt.u32.totalorder %s2227_s12, %s2548_s3 }
  0x3c   :  { %p2233_p12 = pnand %p2231_p11, %p2228_p10 }
  0x3e   :  { %2236 = shalt.err (!%p2233_p12)
}
  0x3f   :  { %s2237_s0 = scalar_lea.vmem %s53_s23, 4096  ;;  %p2242_p0 = scmp.lt.s32.totalorder %s53_s23, %s53_s23 }
  0x40   :  { %p2238_p13 = scmp.ne.s32.totalorder %s53_s23, %s2237_s0  ;;  %p2243_p1 = scmp.lt.s32.totalorder %s2237_s0, %s2237_s0 }
  0x42   :  { %p2244_p2 = por %p2243_p1, %p2242_p0 }
  0x44   :  { %p2245_p3 = pnand %p2244_p2, %p2238_p13 }
  0x46   :  { %2248 = shalt.err (!%p2245_p3)
}
  0x47   :  { %58 = dma.hbm_to_vmem [thread:$0]  %s2548_s3, 4096, %s53_s23, [#allocation6], %s2326_s27, %s2326_s27, %s2327_s28  }
  0x48   :  { %s2249_s20 = scalar_lea.hbm %s2552_s7, 1024 }
  0x49   :  { %p2250_p4 = scmp.ne.s32.totalorder %s2552_s7, %s2249_s20  ;;  %p2253_p5 = scmp.lt.u32.totalorder %s2249_s20, %s2552_s7 }
  0x4b   :  { %p2255_p6 = pnand %p2253_p5, %p2250_p4 }
  0x4d   :  { %2258 = shalt.err (!%p2255_p6)
}
  0x4e   :  { %s2259_s30 = scalar_lea.vmem %s81_s25, 1024  ;;  %p2264_p8 = scmp.lt.s32.totalorder %s81_s25, %s81_s25 }
  0x4f   :  { %p2260_p7 = scmp.ne.s32.totalorder %s81_s25, %s2259_s30  ;;  %p2265_p9 = scmp.lt.s32.totalorder %s2259_s30, %s2259_s30 }
  0x51   :  { %p2266_p10 = por %p2265_p9, %p2264_p8 }
  0x53   :  { %p2267_p11 = pnand %p2266_p10, %p2260_p7 }
  0x55   :  { %2270 = shalt.err (!%p2267_p11)
}
  0x56   :  { %86 = dma.hbm_to_vmem [thread:$0]  %s2552_s7, 1024, %s81_s25, [#allocation9], %s2329_s1, %s2329_s1, %s2330_s18  }
  0x57   :  { %s2336_s28 = smov [#allocation11]   ;;  %s2271_s15 = scalar_lea.hbm %s2554_s9, 1024 }
  0x58   :  { %s94_s23 = sshll.u32 %s2336_s28, 4  ;;  %p2272_p12 = scmp.ne.s32.totalorder %s2554_s9, %s2271_s15  ;;  %s95_s23 = int_to_ptr.vmem [resolvable:$true] %s94_s23 }
  0x59   :  { %p2275_p13 = scmp.lt.u32.totalorder %s2271_s15, %s2554_s9 }
  0x5b   :  { %p2277_p0 = pnand %p2275_p13, %p2272_p12 }
  0x5d   :  { %2280 = shalt.err (!%p2277_p0)
}
  0x5e   :  { %s2281_s19 = scalar_lea.vmem %s95_s23, 1024  ;;  %p2286_p2 = scmp.lt.s32.totalorder %s95_s23, %s95_s23 }
  0x5f   :  { %p2282_p1 = scmp.ne.s32.totalorder %s95_s23, %s2281_s19  ;;  %p2287_p3 = scmp.lt.s32.totalorder %s2281_s19, %s2281_s19 }
  0x61   :  { %p2288_p4 = por %p2287_p3, %p2286_p2 }
  0x63   :  { %p2289_p5 = pnand %p2288_p4, %p2282_p1 }
  0x65   :  { %2292 = shalt.err (!%p2289_p5)
}
  0x66   :  { %100 = dma.hbm_to_vmem [thread:$0]  %s2554_s9, 1024, %s95_s23, [#allocation12], %s2329_s1, %s2329_s1, %s2330_s18  }
  0x67   :  { %2315 = dma.done.wait [#allocation3], 896  }
  0x68   :  { %2316 = vsyncadd [#allocation3], 4294966400 }
  0x69   :  { %2317 = dma.done.wait [#allocation6], 16640  }
  0x6a   :  { %2318 = vsyncadd [#allocation6], 4294950656 }
  0x6b   :  { %2319 = dma.done.wait [#allocation9], 3072  }
  0x6c   :  { %2320 = vsyncadd [#allocation9], 4294964224 }
  0x6d   :  { %2321 = dma.done.wait [#allocation12], 1024  }
  0x6e   :  { %2322 = vsyncadd [#allocation12], 4294966272  ;;  %v1924_v0 = vld [vmem:[#allocation5 + $0x4] ss:$8 sps:$4 sm:$0xff]   ;;  %v1926_v1 = vld [vmem:[#allocation5] ss:$8 sps:$4 sm:$0xff]  }
  0x6f   :  { %769 = vmatprep.subr.bf16.mxu0 %v1924_v0  ;;  %v1927_v2 = vld [vmem:[#allocation5 + $0x14] ss:$8 sps:$4 sm:$0xff]   ;;  %v1929_v3 = vld [vmem:[#allocation5 + $0x10] ss:$8 sps:$4 sm:$0xff]   ;;  %v1930_v4 = vld [vmem:[#allocation5 + $0x24] ss:$8 sps:$4 sm:$0xff]  }
  0x70   :  { %770 = vmatpush1.bf16.msra.mxu0 %v1926_v1  ;;  %v1932_v5 = vld [vmem:[#allocation5 + $0x20] ss:$8 sps:$4 sm:$0xff]   ;;  %v1933_v6 = vld [vmem:[#allocation5 + $0x34] ss:$8 sps:$4 sm:$0xff]   ;;  %v1935_v7 = vld [vmem:[#allocation5 + $0x30] ss:$8 sps:$4 sm:$0xff]  }
  0x71   :  { %771 = vmatprep.subr.bf16.mxu0 %v1927_v2  ;;  %v1936_v8 = vld [vmem:[#allocation5 + $0x44] ss:$8 sps:$4 sm:$0xff]   ;;  %v1938_v9 = vld [vmem:[#allocation5 + $0x40] ss:$8 sps:$4 sm:$0xff]   ;;  %v1939_v10 = vld [vmem:[#allocation5 + $0x54] ss:$8 sps:$4 sm:$0xff]  }
  0x72   :  { %v1941_v11 = vld [vmem:[#allocation5 + $0x50] ss:$8 sps:$4 sm:$0xff]   ;;  %v1942_v12 = vld [vmem:[#allocation5 + $0x64] ss:$8 sps:$4 sm:$0xff]   ;;  %v1944_v14 = vld [vmem:[#allocation5 + $0x60] ss:$8 sps:$4 sm:$0xff]  }
  0x73   :  { %v1974_v13 = vld [vmem:[#allocation2 + $0x4] ss:$28 sps:$4 sm:$0xff]   ;;  %v1945_v15 = vld [vmem:[#allocation5 + $0x74] ss:$8 sps:$4 sm:$0xff]   ;;  %v1947_v16 = vld [vmem:[#allocation5 + $0x70] ss:$8 sps:$4 sm:$0xff]  }
  0x74   :  { %772 = vmatpush1.bf16.msra.mxu0 %v1929_v3  ;;  %801 = vmatprep.mubr.bf16.mxu0 %v1974_v13  ;;  %v1948_v17 = vld [vmem:[#allocation5 + $0x84] ss:$8 sps:$4 sm:$0xff]   ;;  %v1950_v18 = vld [vmem:[#allocation5 + $0x80] ss:$8 sps:$4 sm:$0xff]   ;;  %v1951_v19 = vld [vmem:[#allocation5 + $0x94] ss:$8 sps:$4 sm:$0xff]  }
  0x75   :  { %773 = vmatprep.subr.bf16.mxu0 %v1930_v4  ;;  %v1953_v20 = vld [vmem:[#allocation5 + $0x90] ss:$8 sps:$4 sm:$0xff]   ;;  %v1954_v21 = vld [vmem:[#allocation5 + $0xa4] ss:$8 sps:$4 sm:$0xff]   ;;  %v1956_v22 = vld [vmem:[#allocation5 + $0xa0] ss:$8 sps:$4 sm:$0xff]  }
  0x76   :  { %v1957_v23 = vld [vmem:[#allocation5 + $0xb4] ss:$8 sps:$4 sm:$0xff]   ;;  %v1959_v24 = vld [vmem:[#allocation5 + $0xb0] ss:$8 sps:$4 sm:$0xff]   ;;  %v1960_v25 = vld [vmem:[#allocation5 + $0xc4] ss:$8 sps:$4 sm:$0xff]  }
  0x77   :  { %v1962_v26 = vld [vmem:[#allocation5 + $0xc0] ss:$8 sps:$4 sm:$0xff]   ;;  %v1963_v27 = vld [vmem:[#allocation5 + $0xd4] ss:$8 sps:$4 sm:$0xff]   ;;  %v1965_v28 = vld [vmem:[#allocation5 + $0xd0] ss:$8 sps:$4 sm:$0xff]  }
  0x78   :  { %774 = vmatpush1.bf16.msra.mxu0 %v1932_v5  ;;  %v1966_v29 = vld [vmem:[#allocation5 + $0xe4] ss:$8 sps:$4 sm:$0xff]   ;;  %v1968_v30 = vld [vmem:[#allocation5 + $0xe0] ss:$8 sps:$4 sm:$0xff]   ;;  %v1969_v31 = vld [vmem:[#allocation5 + $0xf4] ss:$8 sps:$4 sm:$0xff]  }
  0x79   :  { %775 = vmatprep.subr.bf16.mxu0 %v1933_v6  ;;  %v1971_v32 = vld [vmem:[#allocation5 + $0xf0] ss:$8 sps:$4 sm:$0xff]   ;;  %v1977_v33 = vld [vmem:[#allocation5 + $0x104] ss:$8 sps:$4 sm:$0xff]   ;;  %v1975_v35 = vld [vmem:[#allocation5 + $0x100] ss:$8 sps:$4 sm:$0xff]  }
  0x7a   :  { %v1972_v34 = vld [vmem:[#allocation2] ss:$28 sps:$4 sm:$0xff]   ;;  %v2025_v36 = vld [vmem:[#allocation2 + $0xc] ss:$28 sps:$4 sm:$0xff]   ;;  %v2337_v38 = vmov 0   ;;  %vm765_vm0 = vcmask 130048  }
  0x7b   :  { %v1980_v37 = vld [vmem:[#allocation5 + $0x114] ss:$8 sps:$4 sm:$0xff]   ;;  %930 = vmatprep.mubr.bf16.mxu1 %v2337_v38  ;;  %v2071_v39 = vld [vmem:[#allocation5 + $0x304] ss:$8 sps:$4 sm:$0xff]   ;;  %v1978_v40 = vld [vmem:[#allocation5 + $0x110] ss:$8 sps:$4 sm:$0xff]  }
  0x7c   :  { %776 = vmatpush1.bf16.msra.mxu0 %v1935_v7  ;;  %v2076_v41 = vld [vmem:[#allocation5 + $0x300] ss:$8 sps:$4 sm:$0xff]   ;;  %v1983_v42 = vld [vmem:[#allocation5 + $0x124] ss:$8 sps:$4 sm:$0xff]   ;;  %898 = vmatprep.subr.bf16.mxu1 %v2071_v39  ;;  %v2081_v45 = vld [vmem:[#allocation7] ss:$8 sps:$4 sm:$0xff]  }
  0x7d   :  { %777 = vmatprep.subr.bf16.mxu0 %v1936_v8  ;;  %v1981_v43 = vld [vmem:[#allocation5 + $0x120] ss:$8 sps:$4 sm:$0xff]   ;;  %899 = vmatpush1.bf16.msra.mxu1 %v2076_v41  ;;  %v2083_v46 = vld [vmem:[#allocation7 + $0x4] ss:$8 sps:$4 sm:$0xff]   ;;  %v2086_v48 = vld [vmem:[#allocation7 + $0x14] ss:$8 sps:$4 sm:$0xff]  }
  0x7e   :  { %v2080_v44 = vld [vmem:[#allocation2 + $0x18] ss:$28 sps:$4 sm:$0xff]   ;;  %1149 = vmatprep.subr.bf16.mxu1 %v2083_v46  ;;  %v1984_v50 = vld [vmem:[#allocation5 + $0x130] ss:$8 sps:$4 sm:$0xff]   ;;  %v1989_v52 = vld [vmem:[#allocation5 + $0x144] ss:$8 sps:$4 sm:$0xff]  }
  0x7f   :  { %v1986_v47 = vld [vmem:[#allocation5 + $0x134] ss:$8 sps:$4 sm:$0xff]   ;;  %v2084_v49 = vld [vmem:[#allocation7 + $0x10] ss:$8 sps:$4 sm:$0xff]   ;;  %v2087_v53 = vld [vmem:[#allocation7 + $0x20] ss:$8 sps:$4 sm:$0xff]  }
  0x80   :  { %778 = vmatpush1.bf16.msra.mxu0 %v1938_v9  ;;  %1735 = vmatmul.mubr.msk.bf16.vlgmr.msra.gmra.mrb[0].mxu1 %vm765_vm0, %v2080_v44  ;;  %v2089_v51 = vld [vmem:[#allocation7 + $0x24] ss:$8 sps:$4 sm:$0xff]   ;;  %v1987_v54 = vld [vmem:[#allocation5 + $0x140] ss:$8 sps:$4 sm:$0xff]   ;;  %v2092_v55 = vld [vmem:[#allocation7 + $0x34] ss:$8 sps:$4 sm:$0xff]  }
  0x81   :  { %779 = vmatprep.subr.bf16.mxu0 %v1939_v10  ;;  %1150 = vmatpush1.bf16.msra.mxu1 %v2081_v45  ;;  %v1992_v56 = vld [vmem:[#allocation5 + $0x154] ss:$8 sps:$4 sm:$0xff]   ;;  %v2090_v57 = vld [vmem:[#allocation7 + $0x30] ss:$8 sps:$4 sm:$0xff]   ;;  %v1990_v58 = vld [vmem:[#allocation5 + $0x150] ss:$8 sps:$4 sm:$0xff]  }
  0x82   :  { %1151 = vmatprep.subr.bf16.mxu1 %v2086_v48  ;;  %v2095_v59 = vld [vmem:[#allocation7 + $0x44] ss:$8 sps:$4 sm:$0xff]   ;;  %v1995_v60 = vld [vmem:[#allocation5 + $0x164] ss:$8 sps:$4 sm:$0xff]   ;;  %v1993_v61 = vld [vmem:[#allocation5 + $0x160] ss:$8 sps:$4 sm:$0xff]  }
  0x83   :  { %v2093_v62 = vld [vmem:[#allocation7 + $0x40] ss:$8 sps:$4 sm:$0xff]   ;;  %v1998_v63 = vld [vmem:[#allocation5 + $0x174] ss:$8 sps:$4 sm:$0xff]   ;;  %v2098_v0 = vld [vmem:[#allocation7 + $0x54] ss:$8 sps:$4 sm:$0xff]  }
  0x84   :  { %780 = vmatpush1.bf16.msra.mxu0 %v1941_v11  ;;  %v2096_v1 = vld [vmem:[#allocation7 + $0x50] ss:$8 sps:$4 sm:$0xff]   ;;  %v1996_v2 = vld [vmem:[#allocation5 + $0x170] ss:$8 sps:$4 sm:$0xff]   ;;  %v2101_v3 = vld [vmem:[#allocation7 + $0x64] ss:$8 sps:$4 sm:$0xff]  }
  0x85   :  { %781 = vmatprep.subr.bf16.mxu0 %v1942_v12  ;;  %1152 = vmatpush1.bf16.msra.mxu1 %v2084_v49  ;;  %v2001_v4 = vld [vmem:[#allocation5 + $0x184] ss:$8 sps:$4 sm:$0xff]   ;;  %v2099_v5 = vld [vmem:[#allocation7 + $0x60] ss:$8 sps:$4 sm:$0xff]   ;;  %v1999_v6 = vld [vmem:[#allocation5 + $0x180] ss:$8 sps:$4 sm:$0xff]  }
  0x86   :  { %1153 = vmatprep.subr.bf16.mxu1 %v2089_v51  ;;  %v2104_v7 = vld [vmem:[#allocation7 + $0x74] ss:$8 sps:$4 sm:$0xff]   ;;  %v2004_v8 = vld [vmem:[#allocation5 + $0x194] ss:$8 sps:$4 sm:$0xff]   ;;  %v2102_v9 = vld [vmem:[#allocation7 + $0x70] ss:$8 sps:$4 sm:$0xff]  }
  0x87   :  { %v2002_v10 = vld [vmem:[#allocation5 + $0x190] ss:$8 sps:$4 sm:$0xff]   ;;  %v2107_v11 = vld [vmem:[#allocation7 + $0x84] ss:$8 sps:$4 sm:$0xff]   ;;  %v2007_v12 = vld [vmem:[#allocation5 + $0x1a4] ss:$8 sps:$4 sm:$0xff]  }
  0x88   :  { %782 = vmatpush1.bf16.msra.mxu0 %v1944_v14  ;;  %v2105_v13 = vld [vmem:[#allocation7 + $0x80] ss:$8 sps:$4 sm:$0xff]   ;;  %v2005_v14 = vld [vmem:[#allocation5 + $0x1a0] ss:$8 sps:$4 sm:$0xff]   ;;  %v2040_v44 = vld [vmem:[#allocation5 + $0x244] ss:$8 sps:$4 sm:$0xff]  }
  0x89   :  { %783 = vmatprep.subr.bf16.mxu0 %v1945_v15  ;;  %1154 = vmatpush1.bf16.msra.mxu1 %v2087_v53  ;;  %v2110_v15 = vld [vmem:[#allocation7 + $0x94] ss:$8 sps:$4 sm:$0xff]   ;;  %v2029_v39 = vld [vmem:[#allocation5 + $0x210] ss:$8 sps:$4 sm:$0xff]   ;;  %v2032_v41 = vld [vmem:[#allocation5 + $0x220] ss:$8 sps:$4 sm:$0xff]  }
  0x8a   :  { %1155 = vmatprep.subr.bf16.mxu1 %v2092_v55  ;;  %v2038_v45 = vld [vmem:[#allocation5 + $0x240] ss:$8 sps:$4 sm:$0xff]   ;;  %v2043_v46 = vld [vmem:[#allocation5 + $0x254] ss:$8 sps:$4 sm:$0xff]   ;;  %v2046_v48 = vld [vmem:[#allocation5 + $0x264] ss:$8 sps:$4 sm:$0xff]  }
  0x8b   :  { %v2044_v49 = vld [vmem:[#allocation5 + $0x260] ss:$8 sps:$4 sm:$0xff]   ;;  %v2047_v51 = vld [vmem:[#allocation5 + $0x270] ss:$8 sps:$4 sm:$0xff]   ;;  %vm2339_vm1 = vmmov 0   ;;  %s2340_s29 = smov [#allocation13]  }
  0x8c   :  { %784 = vmatpush1.bf16.msra.mxu0 %v1947_v16  ;;  %v2010_v16 = vld [vmem:[#allocation5 + $0x1b4] ss:$8 sps:$4 sm:$0xff]   ;;  %v2050_v53 = vld [vmem:[#allocation5 + $0x280] ss:$8 sps:$4 sm:$0xff]   ;;  %v2053_v55 = vld [vmem:[#allocation5 + $0x290] ss:$8 sps:$4 sm:$0xff]  }
  0x8d   :  { %785 = vmatprep.subr.bf16.mxu0 %v1948_v17  ;;  %1156 = vmatpush1.bf16.msra.mxu1 %v2090_v57  ;;  %v2108_v17 = vld [vmem:[#allocation7 + $0x90] ss:$8 sps:$4 sm:$0xff]   ;;  %s1615_s30 = sshll.u32 %s2340_s29, 4  ;;  %s1616_s30 = int_to_ptr.vmem [resolvable:$true] %s1615_s30 }
  0x8e   :  { %1157 = vmatprep.subr.bf16.mxu1 %v2095_v59  ;;  %v2056_v57 = vld [vmem:[#allocation5 + $0x2a0] ss:$8 sps:$4 sm:$0xff]   ;;  %v2059_v59 = vld [vmem:[#allocation5 + $0x2b0] ss:$8 sps:$4 sm:$0xff]   ;;  %p2298_p7 = scmp.lt.s32.totalorder %s1616_s30, %s1616_s30 }
  0x90   :  { %786 = vmatpush1.bf16.msra.mxu0 %v1950_v18  ;;  %v2008_v18 = vld [vmem:[#allocation5 + $0x1b0] ss:$8 sps:$4 sm:$0xff]  }
  0x91   :  { %787 = vmatprep.subr.bf16.mxu0 %v1951_v19  ;;  %1158 = vmatpush1.bf16.msra.mxu1 %v2093_v62  ;;  %v2113_v19 = vld [vmem:[#allocation7 + $0xa4] ss:$8 sps:$4 sm:$0xff]  }
  0x92   :  { %1159 = vmatprep.subr.bf16.mxu1 %v2098_v0  ;;  %v2067_v62 = vld [vmem:[#allocation5 + $0x2d4] ss:$8 sps:$4 sm:$0xff]   ;;  %v2070_v0 = vld [vmem:[#allocation5 + $0x2e4] ss:$8 sps:$4 sm:$0xff]  }
  0x94   :  { %788 = vmatpush1.bf16.msra.mxu0 %v1953_v20  ;;  %v2013_v20 = vld [vmem:[#allocation5 + $0x1c4] ss:$8 sps:$4 sm:$0xff]  }
  0x95   :  { %789 = vmatprep.subr.bf16.mxu0 %v1954_v21  ;;  %1160 = vmatpush1.bf16.msra.mxu1 %v2096_v1  ;;  %v2111_v21 = vld [vmem:[#allocation7 + $0xa0] ss:$8 sps:$4 sm:$0xff]   ;;  %v2068_v1 = vld [vmem:[#allocation5 + $0x2e0] ss:$8 sps:$4 sm:$0xff]  }
  0x96   :  { %1161 = vmatprep.subr.bf16.mxu1 %v2101_v3  ;;  %v2073_v3 = vld [vmem:[#allocation5 + $0x2f0] ss:$8 sps:$4 sm:$0xff]  }
  0x98   :  { %790 = vmatpush1.bf16.msra.mxu0 %v1956_v22  ;;  %v2011_v22 = vld [vmem:[#allocation5 + $0x1c0] ss:$8 sps:$4 sm:$0xff]  }
  0x99   :  { %791 = vmatprep.subr.bf16.mxu0 %v1957_v23  ;;  %1162 = vmatpush1.bf16.msra.mxu1 %v2099_v5  ;;  %v2116_v23 = vld [vmem:[#allocation7 + $0xb4] ss:$8 sps:$4 sm:$0xff]  }
  0x9a   :  { %1163 = vmatprep.subr.bf16.mxu1 %v2104_v7  ;;  %v2122_v5 = vld [vmem:[#allocation7 + $0xd4] ss:$8 sps:$4 sm:$0xff]   ;;  %v2125_v7 = vld [vmem:[#allocation7 + $0xe4] ss:$8 sps:$4 sm:$0xff]  }
  0x9c   :  { %792 = vmatpush1.bf16.msra.mxu0 %v1959_v24  ;;  %v2016_v24 = vld [vmem:[#allocation5 + $0x1d4] ss:$8 sps:$4 sm:$0xff]  }
  0x9d   :  { %793 = vmatprep.subr.bf16.mxu0 %v1960_v25  ;;  %1164 = vmatpush1.bf16.msra.mxu1 %v2102_v9  ;;  %v2114_v25 = vld [vmem:[#allocation7 + $0xb0] ss:$8 sps:$4 sm:$0xff]  }
  0x9e   :  { %1165 = vmatprep.subr.bf16.mxu1 %v2107_v11  ;;  %v2128_v11 = vld [vmem:[#allocation7 + $0xf4] ss:$8 sps:$4 sm:$0xff]  }
  0xa0   :  { %794 = vmatpush1.bf16.msra.mxu0 %v1962_v26  ;;  %v2014_v26 = vld [vmem:[#allocation5 + $0x1d0] ss:$8 sps:$4 sm:$0xff]  }
  0xa1   :  { %795 = vmatprep.subr.bf16.mxu0 %v1963_v27  ;;  %1166 = vmatpush1.bf16.msra.mxu1 %v2105_v13  ;;  %v2119_v27 = vld [vmem:[#allocation7 + $0xc4] ss:$8 sps:$4 sm:$0xff]   ;;  %v2126_v13 = vld [vmem:[#allocation7 + $0xf0] ss:$8 sps:$4 sm:$0xff]  }
  0xa2   :  { %1167 = vmatprep.subr.bf16.mxu1 %v2110_v15  ;;  %v2129_v15 = vld [vmem:[#allocation8 + $0x40] sm:$0xff]  }
  0xa4   :  { %796 = vmatpush1.bf16.msra.mxu0 %v1965_v28  ;;  %v2019_v28 = vld [vmem:[#allocation5 + $0x1e4] ss:$8 sps:$4 sm:$0xff]  }
  0xa5   :  { %797 = vmatprep.subr.bf16.mxu0 %v1966_v29  ;;  %1168 = vmatpush1.bf16.msra.mxu1 %v2108_v17  ;;  %v2117_v29 = vld [vmem:[#allocation7 + $0xc0] ss:$8 sps:$4 sm:$0xff]  }
  0xa6   :  { %1169 = vmatprep.subr.bf16.mxu1 %v2113_v19  ;;  %v228_v19 = vld [vmem:[%s2547_s2] sm:$0x3] }
  0xa8   :  { %798 = vmatpush1.bf16.msra.mxu0 %v1968_v30  ;;  %v2017_v30 = vld [vmem:[#allocation5 + $0x1e0] ss:$8 sps:$4 sm:$0xff]  }
  0xa9   :  { %799 = vmatprep.subr.bf16.mxu0 %v1969_v31  ;;  %1170 = vmatpush1.bf16.msra.mxu1 %v2111_v21  ;;  %v2022_v31 = vld [vmem:[#allocation5 + $0x1f4] ss:$8 sps:$4 sm:$0xff]  }
  0xaa   :  { %1171 = vmatprep.subr.bf16.mxu1 %v2116_v23 }
  0xac   :  { %800 = vmatpush1.bf16.msra.mxu0 %v1971_v32  ;;  %v2020_v32 = vld [vmem:[#allocation5 + $0x1f0] ss:$8 sps:$4 sm:$0xff]  }
  0xad   :  { %812 = vmatprep.subr.bf16.mxu0 %v1977_v33  ;;  %1172 = vmatpush1.bf16.msra.mxu1 %v2114_v25  ;;  %v2028_v33 = vld [vmem:[#allocation5 + $0x204] ss:$8 sps:$4 sm:$0xff]  }
  0xae   :  { %1173 = vmatprep.subr.bf16.mxu1 %v2119_v27 }
  0xaf   :  { %802 = vmatmul.mubr.bf16.vlgmr.msra.gmra.mrb[0].mxu0 %v1972_v34  ;;  %v2023_v34 = vld [vmem:[#allocation2 + $0x8] ss:$28 sps:$4 sm:$0xff]  }
  0xb0   :  { %813 = vmatpush1.bf16.msra.mxu0 %v1975_v35  ;;  %844 = vmatprep.mubr.bf16.mxu0 %v2025_v36  ;;  %v2026_v35 = vld [vmem:[#allocation5 + $0x200] ss:$8 sps:$4 sm:$0xff]   ;;  %v2079_v36 = vld [vmem:[#allocation2 + $0x14] ss:$28 sps:$4 sm:$0xff]  }
  0xb1   :  { %814 = vmatprep.subr.bf16.mxu0 %v1980_v37  ;;  %1174 = vmatpush1.bf16.msra.mxu1 %v2117_v29  ;;  %v2031_v37 = vld [vmem:[#allocation5 + $0x214] ss:$8 sps:$4 sm:$0xff]  }
  0xb2   :  { %1175 = vmatprep.subr.bf16.mxu1 %v2122_v5 }
  0xb4   :  { %815 = vmatpush1.bf16.msra.mxu0 %v1978_v40  ;;  %v2034_v40 = vld [vmem:[#allocation5 + $0x224] ss:$8 sps:$4 sm:$0xff]  }
  0xb5   :  { %816 = vmatprep.subr.bf16.mxu0 %v1983_v42  ;;  %v2037_v42 = vld [vmem:[#allocation5 + $0x234] ss:$8 sps:$4 sm:$0xff]  }
  0xb8   :  { %817 = vmatpush1.bf16.msra.mxu0 %v1981_v43  ;;  %v2035_v43 = vld [vmem:[#allocation5 + $0x230] ss:$8 sps:$4 sm:$0xff]  }
  0xb9   :  { %818 = vmatprep.subr.bf16.mxu0 %v1986_v47  ;;  %v2041_v47 = vld [vmem:[#allocation5 + $0x250] ss:$8 sps:$4 sm:$0xff]  }
  0xbc   :  { %819 = vmatpush1.bf16.msra.mxu0 %v1984_v50  ;;  %v2049_v50 = vld [vmem:[#allocation5 + $0x274] ss:$8 sps:$4 sm:$0xff]  }
  0xbd   :  { %820 = vmatprep.subr.bf16.mxu0 %v1989_v52  ;;  %v2052_v52 = vld [vmem:[#allocation5 + $0x284] ss:$8 sps:$4 sm:$0xff]  }
  0xc0   :  { %821 = vmatpush1.bf16.msra.mxu0 %v1987_v54  ;;  %v2055_v54 = vld [vmem:[#allocation5 + $0x294] ss:$8 sps:$4 sm:$0xff]  }
  0xc1   :  { %822 = vmatprep.subr.bf16.mxu0 %v1992_v56  ;;  %v2058_v56 = vld [vmem:[#allocation5 + $0x2a4] ss:$8 sps:$4 sm:$0xff]  }
  0xc4   :  { %823 = vmatpush1.bf16.msra.mxu0 %v1990_v58  ;;  %v2061_v58 = vld [vmem:[#allocation5 + $0x2b4] ss:$8 sps:$4 sm:$0xff]  }
  0xc5   :  { %824 = vmatprep.subr.bf16.mxu0 %v1995_v60  ;;  %v2064_v60 = vld [vmem:[#allocation5 + $0x2c4] ss:$8 sps:$4 sm:$0xff]  }
  0xc8   :  { %825 = vmatpush1.bf16.msra.mxu0 %v1993_v61  ;;  %v2062_v61 = vld [vmem:[#allocation5 + $0x2c0] ss:$8 sps:$4 sm:$0xff]  }
  0xc9   :  { %826 = vmatprep.subr.bf16.mxu0 %v1998_v63  ;;  %v2065_v63 = vld [vmem:[#allocation5 + $0x2d0] ss:$8 sps:$4 sm:$0xff]  }
  0xcc   :  { %827 = vmatpush1.bf16.msra.mxu0 %v1996_v2  ;;  %v2075_v2 = vld [vmem:[#allocation5 + $0x2f4] ss:$8 sps:$4 sm:$0xff]  }
  0xcd   :  { %828 = vmatprep.subr.bf16.mxu0 %v2001_v4  ;;  %v2077_v4 = vld [vmem:[#allocation2 + $0x10] ss:$28 sps:$4 sm:$0xff]  }
  0xd0   :  { %829 = vmatpush1.bf16.msra.mxu0 %v1999_v6  ;;  %v2120_v6 = vld [vmem:[#allocation7 + $0xd0] ss:$8 sps:$4 sm:$0xff]  }
  0xd1   :  { %830 = vmatprep.subr.bf16.mxu0 %v2004_v8  ;;  %1176 = vmatpush1.bf16.msra.mxu1 %v2120_v6  ;;  %v2123_v8 = vld [vmem:[#allocation7 + $0xe0] ss:$8 sps:$4 sm:$0xff]  }
  0xd2   :  { %1177 = vmatprep.subr.bf16.mxu1 %v2125_v7  ;;  %v2145_v6 = vld [vmem:[#allocation10] sm:$0xff]  }
  0xd4   :  { %831 = vmatpush1.bf16.msra.mxu0 %v2002_v10 }
  0xd5   :  { %832 = vmatprep.subr.bf16.mxu0 %v2007_v12  ;;  %1178 = vmatpush1.bf16.msra.mxu1 %v2123_v8  ;;  %v2146_v8 = vld [vmem:[#allocation10 + $0x8] sm:$0xff]  }
  0xd6   :  { %1179 = vmatprep.subr.bf16.mxu1 %v2128_v11  ;;  %v2149_v11 = vld [vmem:[#allocation10 + $0x20] sm:$0xff]  }
  0xd8   :  { %833 = vmatpush1.bf16.msra.mxu0 %v2005_v14 }
  0xd9   :  { %834 = vmatprep.subr.bf16.mxu0 %v2010_v16  ;;  %1180 = vmatpush1.bf16.msra.mxu1 %v2126_v13  ;;  %v230_v16 = vlaneseq  ;;  %v2151_v13 = vld [vmem:[#allocation10 + $0x30] sm:$0xff]  }
  0xda   :  { %1812 = vmatprep.subr.bf16.mxu1 %v2129_v15 }
  0xdb   :  { %v231_v17 = vshrl.u32 %v230_v16, 7 }
  0xdc   :  { %835 = vmatpush1.bf16.msra.mxu0 %v2008_v18 }
  0xdd   :  { %836 = vmatprep.subr.bf16.mxu0 %v2013_v20  ;;  %v232_v18 = vsub.s32 0, %v231_v17  ;;  %v236_v20 = vsub.s32 1, %v231_v17 }
  0xdf   :  { %v233_v21 = vrot.slane %v228_v19, %v232_v18 }
  0xe0   :  { %837 = vmatpush1.bf16.msra.mxu0 %v2011_v22  ;;  %v237_v22 = vrot.slane %v228_v19, %v236_v20  ;;  %v1768_v19 = vld [vmem:[%s2551_s6] ss:$0 sm:$0xff] }
  0xe1   :  { %838 = vmatprep.subr.bf16.mxu0 %v2016_v24 }
  0xe4   :  { %839 = vmatpush1.bf16.msra.mxu0 %v2014_v26 }
  0xe5   :  { %840 = vmatprep.subr.bf16.mxu0 %v2019_v28 }
  0xe8   :  { %841 = vmatpush1.bf16.msra.mxu0 %v2017_v30 }
  0xe9   :  { %842 = vmatprep.subr.bf16.mxu0 %v2022_v31 }
  0xec   :  { %843 = vmatpush1.bf16.msra.mxu0 %v2020_v32 }
  0xed   :  { %855 = vmatprep.subr.bf16.mxu0 %v2028_v33 }
  0xef   :  { %845 = vmatmul.mubr.bf16.vlgmr.msra.gmra.mrb[0].mxu0 %v2023_v34 }
  0xf0   :  { %856 = vmatpush1.bf16.msra.mxu0 %v2026_v35  ;;  %887 = vmatprep.mubr.bf16.mxu0 %v2079_v36 }
  0xf1   :  { %857 = vmatprep.subr.bf16.mxu0 %v2031_v37 }
  0xf4   :  { %858 = vmatpush1.bf16.msra.mxu0 %v2029_v39  ;;  %v2130_v39 = vld [vmem:[#allocation8] sm:$0xff]  }
  0xf5   :  { %859 = vmatprep.subr.bf16.mxu0 %v2034_v40 }
  0xf8   :  { %860 = vmatpush1.bf16.msra.mxu0 %v2032_v41  ;;  %v2131_v41 = vld [vmem:[#allocation8 + $0x48] sm:$0xff]  }
  0xf9   :  { %861 = vmatprep.subr.bf16.mxu0 %v2037_v42  ;;  %v2132_v42 = vld [vmem:[#allocation8 + $0x8] sm:$0xff]  }
  0xfc   :  { %862 = vmatpush1.bf16.msra.mxu0 %v2035_v43  ;;  %v2133_v43 = vld [vmem:[#allocation8 + $0x50] sm:$0xff]  }
  0xfd   :  { %863 = vmatprep.subr.bf16.mxu0 %v2040_v44  ;;  %v2134_v44 = vld [vmem:[#allocation8 + $0x10] sm:$0xff]  }
 0x100   :  { %864 = vmatpush1.bf16.msra.mxu0 %v2038_v45  ;;  %v2135_v45 = vld [vmem:[#allocation8 + $0x58] sm:$0xff]  }
 0x101   :  { %865 = vmatprep.subr.bf16.mxu0 %v2043_v46  ;;  %v2136_v46 = vld [vmem:[#allocation8 + $0x18] sm:$0xff]  }
 0x104   :  { %866 = vmatpush1.bf16.msra.mxu0 %v2041_v47  ;;  %v2137_v47 = vld [vmem:[#allocation8 + $0x60] sm:$0xff]  }
 0x105   :  { %867 = vmatprep.subr.bf16.mxu0 %v2046_v48  ;;  %v2138_v48 = vld [vmem:[#allocation8 + $0x20] sm:$0xff]  }
 0x108   :  { %868 = vmatpush1.bf16.msra.mxu0 %v2044_v49  ;;  %v2139_v49 = vld [vmem:[#allocation8 + $0x68] sm:$0xff]  }
 0x109   :  { %869 = vmatprep.subr.bf16.mxu0 %v2049_v50  ;;  %v2140_v50 = vld [vmem:[#allocation8 + $0x28] sm:$0xff]  }
 0x10c   :  { %870 = vmatpush1.bf16.msra.mxu0 %v2047_v51  ;;  %v2141_v51 = vld [vmem:[#allocation8 + $0x70] sm:$0xff]  }
 0x10d   :  { %871 = vmatprep.subr.bf16.mxu0 %v2052_v52  ;;  %v2142_v52 = vld [vmem:[#allocation8 + $0x30] sm:$0xff]  }
 0x110   :  { %872 = vmatpush1.bf16.msra.mxu0 %v2050_v53  ;;  %v2143_v53 = vld [vmem:[#allocation8 + $0x78] sm:$0xff]  }
 0x111   :  { %873 = vmatprep.subr.bf16.mxu0 %v2055_v54  ;;  %v2144_v54 = vld [vmem:[#allocation8 + $0x38] sm:$0xff]  }
 0x114   :  { %874 = vmatpush1.bf16.msra.mxu0 %v2053_v55  ;;  %v2338_v55 = vmov 0.0  }
 0x115   :  { %875 = vmatprep.subr.bf16.mxu0 %v2058_v56  ;;  %v977_v56 = vld [vmem:[%s2549_s4] sm:$0x3] }
 0x118   :  { %876 = vmatpush1.bf16.msra.mxu0 %v2056_v57  ;;  %v982_v57 = vrot.slane %v977_v56, %v232_v18 }
 0x119   :  { %877 = vmatprep.subr.bf16.mxu0 %v2061_v58 }
 0x11c   :  { %878 = vmatpush1.bf16.msra.mxu0 %v2059_v59  ;;  %v986_v59 = vrot.slane %v977_v56, %v236_v20 }
 0x11d   :  { %879 = vmatprep.subr.bf16.mxu0 %v2064_v60 }
 0x120   :  { %880 = vmatpush1.bf16.msra.mxu0 %v2062_v61 }
 0x121   :  { %881 = vmatprep.subr.bf16.mxu0 %v2067_v62 }
 0x124   :  { %882 = vmatpush1.bf16.msra.mxu0 %v2065_v63 }
 0x125   :  { %883 = vmatprep.subr.bf16.mxu0 %v2070_v0 }
 0x128   :  { %884 = vmatpush1.bf16.msra.mxu0 %v2068_v1 }
 0x129   :  { %885 = vmatprep.subr.bf16.mxu0 %v2075_v2 }
 0x12c   :  { %886 = vmatpush1.bf16.msra.mxu0 %v2073_v3 }
 0x12f   :  { %888 = vmatmul.mubr.bf16.vlgmr.msra.gmra.mrb[0].mxu0 %v2077_v4 }
 0x153   :  { %v932_v9 = vpop.f32.mrb[0].mxu1 }
 0x154   :  { %v934_v10 = vpop.f32.mrb[1].mxu1 }
 0x155   :  { %v936_v12 = vpop.f32.mrb[2].mxu1 }
 0x156   :  { %v938_v14 = vpop.f32.mrb[3].mxu1 }
 0x202   :  { %v889_v23 = vpop.f32.mrb[0].mxu0 }
 0x203   :  { %v1892_v24 = vadd.f32 %v889_v23, %v233_v21  ;;  %v891_v25 = vpop.f32.mrb[1].mxu0 }
 0x204   :  { %v1894_v26 = vadd.f32 %v891_v25, %v237_v22  ;;  %v893_v27 = vpop.f32.mrb[2].mxu0  ;;  %v2153_v25 = vld [vmem:[#allocation11] sm:$0xff]  }
 0x205   :  { %v1893_v28 = vadd.f32 %v1892_v24, %v932_v9  ;;  %v1896_v29 = vadd.f32 %v893_v27, %v233_v21  ;;  %v895_v30 = vpop.f32.mrb[3].mxu0  ;;  %v2147_v9 = vld [vmem:[#allocation10 + $0x10] sm:$0xff]   ;;  %v2154_v27 = vld [vmem:[#allocation11 + $0x8] sm:$0xff]  }
 0x206   :  { %v1895_v31 = vadd.f32 %v1894_v26, %v934_v10  ;;  %v1898_v32 = vadd.f32 %v895_v30, %v237_v22  ;;  %v2148_v10 = vld [vmem:[#allocation10 + $0x18] sm:$0xff]   ;;  %v2157_v30 = vld [vmem:[#allocation11 + $0x20] sm:$0xff]  }
 0x207   :  { %v1897_v33 = vadd.f32 %v1896_v29, %v936_v12  ;;  %v2150_v12 = vld [vmem:[#allocation10 + $0x28] sm:$0xff]   ;;  %v2156_v29 = vld [vmem:[#allocation11 + $0x18] sm:$0xff]  }
 0x208   :  { %v1899_v34 = vadd.f32 %v1898_v32, %v938_v14  ;;  %v2152_v14 = vld [vmem:[#allocation10 + $0x38] sm:$0xff]   ;;  %v2159_v32 = vld [vmem:[#allocation11 + $0x30] sm:$0xff]  }
 0x209   :  { %v941_v35 = vpack.c.bf16 %v1897_v33, %v1893_v28  ;;  %v2155_v28 = vld [vmem:[#allocation11 + $0x10] sm:$0xff]   ;;  %v2160_v33 = vld [vmem:[#allocation11 + $0x38] sm:$0xff]  }
 0x20a   :  { %v942_v36 = vpack.c.bf16 %v1899_v34, %v1895_v31  ;;  %v2158_v31 = vld [vmem:[#allocation11 + $0x28] sm:$0xff]   ;;  %v1785_v34 = vld [vmem:[%s2553_s8] ss:$0 sm:$0xff]  ;;  %s2293_s8 = scalar_lea.vmem %s1616_s30, 128 }
 0x20b   :  { %v943_v40 = vmax.bf16 %v2337_v38, %v941_v35  ;;  %p2294_p6 = scmp.ne.s32.totalorder %s1616_s30, %s2293_s8  ;;  %p2299_p8 = scmp.lt.s32.totalorder %s2293_s8, %s2293_s8 }
 0x20c   :  { %v944_v37 = vmax.bf16 %v2337_v38, %v942_v36 }
 0x20d   :  { %p2300_p9 = por %p2299_p8, %p2298_p7 }
 0x20e   :  { %1181 = vmatprep.mubr.bf16.mxu1 %v944_v37 }
 0x20f   :  { %1182 = vmatmul.mubr.bf16.vlgmr.msra.gmra.mrb[4].mxu1 %v943_v40  ;;  %p2301_p10 = pnand %p2300_p9, %p2294_p6 }
 0x210   :  { %1813 = vmatpush3.bf16.msra.mxu1 %v2130_v39 }
 0x211   :  { %1814 = vmatprep.subr.bf16.mxu1 %v2131_v41 }
 0x214   :  { %1815 = vmatpush3.bf16.msra.mxu1 %v2132_v42 }
 0x215   :  { %1816 = vmatprep.subr.bf16.mxu1 %v2133_v43 }
 0x218   :  { %1817 = vmatpush3.bf16.msra.mxu1 %v2134_v44  ;;  %v1794_v44 = vld [vmem:[%s2555_s10] ss:$0 sm:$0xff] }
 0x219   :  { %1818 = vmatprep.subr.bf16.mxu1 %v2135_v45 }
 0x21c   :  { %1819 = vmatpush3.bf16.msra.mxu1 %v2136_v46 }
 0x21d   :  { %1820 = vmatprep.subr.bf16.mxu1 %v2137_v47 }
 0x220   :  { %1821 = vmatpush3.bf16.msra.mxu1 %v2138_v48 }
 0x221   :  { %1822 = vmatprep.subr.bf16.mxu1 %v2139_v49 }
 0x224   :  { %1823 = vmatpush3.bf16.msra.mxu1 %v2140_v50 }
 0x225   :  { %1824 = vmatprep.subr.bf16.mxu1 %v2141_v51 }
 0x228   :  { %1825 = vmatpush3.bf16.msra.mxu1 %v2142_v52 }
 0x229   :  { %1826 = vmatprep.subr.bf16.mxu1 %v2143_v53 }
 0x22c   :  { %1827 = vmatpush3.bf16.msra.mxu1 %v2144_v54 }
 0x22d   :  { %1852 = vmatprep.subr.bf16.mxu1 %v2338_v55 }
 0x2e2   :  { %v1183_v58 = vpop.f32.mrb[4].mxu1 }
 0x2e3   :  { %v1185_v60 = vpop.f32.mrb[5].mxu1  ;;  %v1184_v62 = vadd.f32 %v1183_v58, %v982_v57 }
 0x2e4   :  { %v1187_v61 = vpop.f32.mrb[6].mxu1  ;;  %v1186_v1 = vadd.f32 %v1185_v60, %v986_v59 }
 0x2e5   :  { %v1188_v63 = vadd.f32 %v1187_v61, %v982_v57  ;;  %v1189_v0 = vpop.f32.mrb[7].mxu1 }
 0x2e6   :  { %v1190_v2 = vadd.f32 %v1189_v0, %v986_v59 }
 0x2e7   :  { %v1192_v3 = vpack.c.bf16 %v1188_v63, %v1184_v62 }
 0x2e8   :  { %v1193_v4 = vpack.c.bf16 %v1190_v2, %v1186_v1 }
 0x2e9   :  { %v1194_v7 = vmax.bf16 %v2337_v38, %v1192_v3 }
 0x2ea   :  { %v1195_v5 = vmax.bf16 %v2337_v38, %v1193_v4 }
 0x2ec   :  { %1363 = vmatprep.mubr.bf16.mxu1 %v1195_v5 }
 0x2ed   :  { %1364 = vmatmul.mubr.bf16.vlgmr.msra.gmra.mrb[8].mxu1 %v1194_v7 }
 0x2ee   :  { %1853 = vmatpush3.bf16.msra.mxu1 %v2145_v6  ;;  %1868 = vmatprep.mubr.msk.bf16.mxu1 %vm2339_vm1, %v2338_v55 }
 0x2ef   :  { %1854 = vmatprep.subr.bf16.mxu1 %v2338_v55 }
 0x2f2   :  { %1855 = vmatpush3.bf16.msra.mxu1 %v2146_v8 }
 0x2f3   :  { %1856 = vmatprep.subr.bf16.mxu1 %v2338_v55 }
 0x2f6   :  { %1857 = vmatpush3.bf16.msra.mxu1 %v2147_v9 }
 0x2f7   :  { %1858 = vmatprep.subr.bf16.mxu1 %v2338_v55 }
 0x2fa   :  { %1859 = vmatpush3.bf16.msra.mxu1 %v2148_v10 }
 0x2fb   :  { %1860 = vmatprep.subr.bf16.mxu1 %v2338_v55 }
 0x2fe   :  { %1861 = vmatpush3.bf16.msra.mxu1 %v2149_v11 }
 0x2ff   :  { %1862 = vmatprep.subr.bf16.mxu1 %v2338_v55 }
 0x302   :  { %1863 = vmatpush3.bf16.msra.mxu1 %v2150_v12 }
 0x303   :  { %1864 = vmatprep.subr.bf16.mxu1 %v2338_v55 }
 0x306   :  { %1865 = vmatpush3.bf16.msra.mxu1 %v2151_v13 }
 0x307   :  { %1866 = vmatprep.subr.bf16.mxu1 %v2338_v55 }
 0x30a   :  { %1867 = vmatpush3.bf16.msra.mxu1 %v2152_v14 }
 0x30b   :  { %1872 = vmatprep.subr.bf16.mxu1 %v2338_v55 }
 0x3c0   :  { %v1828_v15 = vpop.f32.mrb[8].mxu1 }
 0x3c1   :  { %v1829_v16 = vpop.f32.mrb[9].mxu1 }
 0x3c2   :  { %v1830_v17 = vadd.f32 %v1829_v16, %v1828_v15  ;;  %v1831_v18 = vpop.f32.mrb[10].mxu1 }
 0x3c3   :  { %v1832_v20 = vpop.f32.mrb[11].mxu1 }
 0x3c4   :  { %v1833_v21 = vadd.f32 %v1832_v20, %v1831_v18  ;;  %v1366_v22 = vadd.f32 %v1830_v17, %v1768_v19 }
 0x3c6   :  { %v1369_v23 = vadd.f32 %v1833_v21, %v1768_v19 }
 0x3c8   :  { %v1372_v24 = vpack.c.bf16 %v1369_v23, %v1366_v22 }
 0x3ca   :  { %v1373_v26 = vmax.bf16 %v2337_v38, %v1372_v24 }
 0x3cc   :  { %1869 = vmatmul.mubr.bf16.vlgmr.msra.gmra.mrb[12].mxu1 %v1373_v26 }
 0x3cd   :  { %1873 = vmatpush3.bf16.msra.mxu1 %v2153_v25  ;;  %1888 = vmatprep.mubr.msk.bf16.mxu1 %vm2339_vm1, %v2338_v55 }
 0x3ce   :  { %1874 = vmatprep.subr.bf16.mxu1 %v2338_v55 }
 0x3d1   :  { %1875 = vmatpush3.bf16.msra.mxu1 %v2154_v27 }
 0x3d2   :  { %1876 = vmatprep.subr.bf16.mxu1 %v2338_v55 }
 0x3d5   :  { %1877 = vmatpush3.bf16.msra.mxu1 %v2155_v28 }
 0x3d6   :  { %1878 = vmatprep.subr.bf16.mxu1 %v2338_v55 }
 0x3d9   :  { %1879 = vmatpush3.bf16.msra.mxu1 %v2156_v29 }
 0x3da   :  { %1880 = vmatprep.subr.bf16.mxu1 %v2338_v55 }
 0x3dd   :  { %1881 = vmatpush3.bf16.msra.mxu1 %v2157_v30 }
 0x3de   :  { %1882 = vmatprep.subr.bf16.mxu1 %v2338_v55 }
 0x3e1   :  { %1883 = vmatpush3.bf16.msra.mxu1 %v2158_v31 }
 0x3e2   :  { %1884 = vmatprep.subr.bf16.mxu1 %v2338_v55 }
 0x3e5   :  { %1885 = vmatpush3.bf16.msra.mxu1 %v2159_v32 }
 0x3e6   :  { %1886 = vmatprep.subr.bf16.mxu1 %v2338_v55 }
 0x3e9   :  { %1887 = vmatpush3.bf16.msra.mxu1 %v2160_v33 }
 0x49f   :  { %v1479_v35 = vpop.f32.mrb[12].mxu1 }
 0x4a0   :  { %v1870_v36 = vpop.f32.mrb[13].mxu1  ;;  %v1480_v39 = vadd.f32 %v1785_v34, %v1479_v35 }
 0x4a1   :  { %v1482_v37 = vpop.f32.mrb[14].mxu1 }
 0x4a2   :  { %v1483_v40 = vadd.f32 %v1785_v34, %v1482_v37  ;;  %v1871_v41 = vpop.f32.mrb[15].mxu1 }
 0x4a4   :  { %v1486_v42 = vpack.c.bf16 %v1483_v40, %v1480_v39 }
 0x4a6   :  { %v1487_v43 = vmax.bf16 %v2337_v38, %v1486_v42 }
 0x4a8   :  { %1889 = vmatmul.mubr.bf16.vlgmr.msra.gmra.mrb[16].mxu1 %v1487_v43 }
 0x57b   :  { %v1593_v45 = vpop.f32.mrb[16].mxu1 }
 0x57c   :  { %v1890_v46 = vpop.f32.mrb[17].mxu1  ;;  %v1594_v48 = vadd.f32 %v1794_v44, %v1593_v45 }
 0x57d   :  { %v1596_v47 = vpop.f32.mrb[18].mxu1 }
 0x57e   :  { %v1597_v49 = vadd.f32 %v1794_v44, %v1596_v47  ;;  %v1891_v50 = vpop.f32.mrb[19].mxu1 }
 0x580   :  { %v1810_v51 = vpack.c.bf16 %v1597_v49, %v1594_v48 }
 0x582   :  { %1811 = vst [vmem:[#allocation13] sm:$0xff] %v1810_v51  }
 0x583   :  { %2304 = shalt.err (!%p2301_p10)
}
 0x584   :  { %s2305_s27 = scalar_lea.hbm %s2556_s11, 128 }
 0x585   :  { %p2306_p11 = scmp.ne.s32.totalorder %s2556_s11, %s2305_s27  ;;  %p2309_p12 = scmp.lt.u32.totalorder %s2305_s27, %s2556_s11 }
 0x587   :  { %p2311_p13 = pnand %p2309_p12, %p2306_p11 }
 0x589   :  { %2314 = shalt.err (!%p2311_p13)
}
 0x58a   :  { %1621 = dma.vmem_to_hbm [thread:$0]  %s1616_s30, 128, %s2556_s11, [#allocation4], %s2329_s1, %s2329_s1, %s2330_s18  }
 0x58b   :  { %2323 = dma.done.wait [#allocation4], 128  }
 0x58c   :  { %2324 = vsyncadd [#allocation4], 4294967168 }
 0x58d   :  { %1625 = vsyncpa [#allocation3], 1 }
 0x58e   :  { %1626 = vsyncpa [#allocation6], 1 }
 0x58f   :  { %1627 = vsyncpa [#allocation9], 1 }
 0x590   :  { %1628 = vsyncpa [#allocation12], 1 }
 0x591   :  { %1629 = vsyncpa [#allocation4], 1 }

</bundles_post_ra>
